<compile_context>
chip_gen: v6e
topology: v6e:2x2x1
jax: 0.10.0
libtpu: 0.0.40
codegen_flags: <defaults>
</compile_context>

<pallas_src>
import functools

import numpy as np
import jax
import jax.numpy as jnp
from jax.experimental import pallas as pl
from jax.experimental.pallas import tpu as pltpu

_SUB = 128  # samples packed per row (lane group size)


def _quantile_loss_kernel(qcoef_ref, expand_ref, preds_ref, target_ref, out_ref, *,
                          tile_rows, rows_valid, need_row_mask, target_exact_bf16):
    # grid = (num_cores, steps): axis 0 "parallel" (megacore), axis 1 "arbitrary" (reduction).
    c = pl.program_id(0)
    i = pl.program_id(1)
    ni = pl.num_programs(1)
    blk = c * ni + i  # global row-block index

    @pl.when(i == 0)
    def _init():
        out_ref[...] = jnp.zeros_like(out_ref)

    p = preds_ref[...].astype(jnp.float32)    # (TR, Q*128) sample-major interleaved
    t = target_ref[...].astype(jnp.float32)   # (TR, 128)
    expand = expand_ref[...]                  # (128, Q*128) bf16 one-hot repeat matrix

    # Lane-expand target: te[r, s*Q + q] = t[r, s], done on the idle MXU.
    # Exactness: split the f32 target into bf16 chunks (Dekker split); each chunk
    # times the 0/1 matrix is exact, accumulation in f32.
    t_hi = t.astype(jnp.bfloat16)
    te = jnp.dot(t_hi, expand, preferred_element_type=jnp.float32)
    if not target_exact_bf16:
        r1 = t - t_hi.astype(jnp.float32)
        t_mid = r1.astype(jnp.bfloat16)
        t_lo = (r1 - t_mid.astype(jnp.float32)).astype(jnp.bfloat16)
        te = te + jnp.dot(t_mid, expand, preferred_element_type=jnp.float32)
        te = te + jnp.dot(t_lo, expand, preferred_element_type=jnp.float32)

    err = te - p                              # (TR, Q*128)
    qm1 = qcoef_ref[0:1, :]                   # (1, Q*128)  = q - 1
    qq = qcoef_ref[1:2, :]                    # (1, Q*128)  = q
    pin = jnp.maximum(qm1 * err, qq * err)    # pinball loss per element

    # Tail (grid-overrun rows) masked only on each core's final step (mask hoisted
    # out of the hot loop).
    if need_row_mask:
        @pl.when(i == ni - 1)
        def _masked():
            row = jax.lax.broadcasted_iota(jnp.int32, pin.shape, 0)
            ok = (blk * tile_rows + row) < rows_valid
            out_ref[0:1, :] += jnp.sum(jnp.where(ok, pin, 0.0), axis=0, keepdims=True)

        @pl.when(i != ni - 1)
        def _unmasked():
            out_ref[0:1, :] += jnp.sum(pin, axis=0, keepdims=True)
    else:
        out_ref[0:1, :] += jnp.sum(pin, axis=0, keepdims=True)


def quantile_loss(preds, target, quantiles, *, tile_rows=2048, allow_two_cores=True):
    """Pallas implementation of QuantileLoss.forward.

    preds:     (N, Q) array (any float dtype; streamed natively, cast to f32 in-kernel)
    target:    (N,)   array
    quantiles: python list/tuple of Q floats (compile-time constants)
    Returns a scalar float32 loss.
    """
    n_total, q_n = preds.shape
    assert target.shape[0] == n_total, "preds.shape[0] must equal target.shape[0]"
    lanes = q_n * _SUB

    # Pad the sample count to a multiple of 128 so the packed reshape is legal.
    # Zero samples (pred=0, target=0) contribute exactly 0 to the summed loss.
    n_pad = (-n_total) % _SUB
    if n_pad:
        # TODO(synk): this pad is an extra HBM pass; feed 128-aligned N upstream to
        #             stay at the ~16 B/sample roofline.
        preds = jnp.pad(preds, ((0, n_pad), (0, 0)))
        target = jnp.pad(target, ((0, n_pad),))
    rows = (n_total + n_pad) // _SUB

    # Free row-major repacks (no transpose, no extra HBM pass):
    preds_p = preds.reshape(rows, lanes)     # lane c -> (sample c//Q, quantile c%Q)
    target_p = target.reshape(rows, _SUB)    # lane s -> sample s

    tile_rows = max(1, min(tile_rows, rows))
    if tile_rows < rows and tile_rows % 8:
        tile_rows = max(8, (tile_rows // 8) * 8)
    nb = -(-rows // tile_rows)
    need_row_mask = (rows % tile_rows) != 0

    # v7x megacore: split row-blocks across the two TensorCores when it divides evenly
    # (harmless serial loop on v5e/v6e).
    num_cores = 2 if (allow_two_cores and nb >= 2 and nb % 2 == 0) else 1
    nb_per_core = nb // num_cores

    # Tiny compile-time constants; constant index_map -> DMA'd once, kept resident.
    qs = np.asarray(quantiles, dtype=np.float32)
    q_lane = np.tile(qs, _SUB)                                           # q[c % Q]
    qcoef = jnp.asarray(np.stack([q_lane - np.float32(1.0), q_lane]),
                        dtype=jnp.float32)                               # (2, lanes)
    col_src = np.arange(lanes) // q_n                                    # c -> c // Q
    expand = jnp.asarray(
        (col_src[None, :] == np.arange(_SUB)[:, None]).astype(np.float32),
        dtype=jnp.bfloat16)                                              # (128, lanes)

    kernel = functools.partial(
        _quantile_loss_kernel,
        tile_rows=tile_rows,
        rows_valid=rows,
        need_row_mask=need_row_mask,
        target_exact_bf16=(target.dtype == jnp.bfloat16),
    )

    out = pl.pallas_call(
        kernel,
        out_shape=jax.ShapeDtypeStruct((num_cores * 8, lanes), jnp.float32),
        grid=(num_cores, nb_per_core),
        in_specs=[
            pl.BlockSpec((2, lanes), lambda c, i: (0, 0)),                    # qcoef
            pl.BlockSpec((_SUB, lanes), lambda c, i: (0, 0)),                 # expand
            pl.BlockSpec((tile_rows, lanes),
                         lambda c, i: (c * nb_per_core + i, 0)),              # preds
            pl.BlockSpec((tile_rows, _SUB),
                         lambda c, i: (c * nb_per_core + i, 0)),              # target
        ],
        out_specs=pl.BlockSpec((8, lanes), lambda c, i: (c, 0)),              # per-core partials
        compiler_params=pltpu.CompilerParams(
            dimension_semantics=("parallel", "arbitrary"),
        ),
    )(qcoef, expand, preds_p, target_p)

    return jnp.sum(out) / jnp.float32(n_total)


def _reference_quantile_loss(preds, target, quantiles):
    """Pure-JAX reference matching the PyTorch module."""
    preds = preds.astype(jnp.float32)
    target = target.astype(jnp.float32)
    losses = []
    for i, q in enumerate(quantiles):
        errors = target - preds[:, i]
        losses.append(jnp.maximum((q - 1.0) * errors, q * errors)[:, None])
    return jnp.mean(jnp.sum(jnp.concatenate(losses, axis=1), axis=1))


if __name__ == "__main__":
    quantiles = [0.1, 0.5, 0.9]
    Q = len(quantiles)

    key = jax.random.PRNGKey(0)
    kp, kt = jax.random.split(key)

    def check(n, dtype=jnp.float32, **kw):
        p = jax.random.normal(kp, (n, Q), dtype=jnp.float32).astype(dtype)
        t = jax.random.normal(kt, (n,), dtype=jnp.float32).astype(dtype)
        got = jax.block_until_ready(quantile_loss(p, t, quantiles, **kw))
        want = _reference_quantile_loss(p, t, quantiles)
        assert jnp.allclose(got, want, atol=2e-4, rtol=2e-4), (n, dtype, got, want)

    check(1024)                       # aligned, single block, single grid step
    check(1000)                       # ragged N -> zero-pad path
    check(65536, tile_rows=128)       # multi-block + 2-TensorCore parallel split
    check(40000, tile_rows=64)        # odd block count + masked tail block
    check(1024, dtype=jnp.bfloat16)   # bf16 streaming (single exact MXU expansion pass)

    print("KERNEL_OK")
</pallas_src>

<mosaic_0001>
module attributes {stable_mosaic.version = 11 : i64} {
  func.func @_quantile_loss_kernel(%arg0: i32, %arg1: i32, %arg2: memref<2x384xf32, #tpu.memory_space<vmem>>, %arg3: memref<128x384xbf16, #tpu.memory_space<vmem>>, %arg4: memref<8x384xf32, #tpu.memory_space<vmem>>, %arg5: memref<8x128xf32, #tpu.memory_space<vmem>>, %arg6: memref<8x384xf32, #tpu.memory_space<vmem>>) attributes {dimension_semantics = [#tpu.dimension_semantics<parallel>, #tpu.dimension_semantics<arbitrary>], iteration_bounds = array<i64: 1, 1>, scalar_prefetch = 0 : i64, scratch_operands = 0 : i64, tpu.core_type = #tpu.core_type<tc>, window_params = [{pipeline_mode = #tpu.pipeline_mode<synchronous>, transform_indices = @transform_0, window_bounds = array<i64: 2, 384>}, {pipeline_mode = #tpu.pipeline_mode<synchronous>, transform_indices = @transform_1, window_bounds = array<i64: 128, 384>}, {transform_indices = @transform_2, window_bounds = array<i64: 8, 384>}, {transform_indices = @transform_3, window_bounds = array<i64: 8, 128>}, {transform_indices = @transform_4, window_bounds = array<i64: 8, 384>}]} {
    %c0_i32 = arith.constant 0 : i32
    %0 = arith.cmpi eq, %arg1, %c0_i32 : i32
    %1 = arith.extui %0 : i1 to i32
    %c0_i32_0 = arith.constant 0 : i32
    %2 = arith.cmpi ne, %1, %c0_i32_0 : i32
    scf.if %2 {
      %cst_16 = arith.constant 0.000000e+00 : f32
      %31 = vector.broadcast %cst_16 : f32 to vector<8x384xf32>
      %c0_17 = arith.constant 0 : index
      %c0_18 = arith.constant 0 : index
      %32 = vector.load %arg6[%c0_17, %c0_18] : memref<8x384xf32, #tpu.memory_space<vmem>>, vector<8x384xf32>
      tpu.vector_store %arg6[%c0_17, %c0_18], %31 {strides = array<i32>} : memref<8x384xf32, #tpu.memory_space<vmem>>, vector<8x384xf32>,
    } else {
    }
    %c0 = arith.constant 0 : index
    %c0_1 = arith.constant 0 : index
    %3 = vector.load %arg4[%c0, %c0_1] : memref<8x384xf32, #tpu.memory_space<vmem>>, vector<8x384xf32>
    %c0_2 = arith.constant 0 : index
    %c0_3 = arith.constant 0 : index
    %4 = vector.load %arg5[%c0_2, %c0_3] : memref<8x128xf32, #tpu.memory_space<vmem>>, vector<8x128xf32>
    %c0_4 = arith.constant 0 : index
    %c0_5 = arith.constant 0 : index
    %5 = vector.load %arg3[%c0_4, %c0_5] : memref<128x384xbf16, #tpu.memory_space<vmem>>, vector<128x384xbf16>
    %6 = arith.truncf %4 : vector<8x128xf32> to vector<8x128xbf16>
    %cst = arith.constant dense<0.000000e+00> : vector<8x384xf32>
    %7 = tpu.matmul %6, %5, %cst {dimension_numbers = #tpu.dot_dimension_numbers<[1], [0], [0], [1], [0, 0, 1, 1], [], []>} : vector<8x128xbf16>, vector<128x384xbf16>, vector<8x384xf32> -> vector<8x384xf32>
    %8 = arith.extf %6 : vector<8x128xbf16> to vector<8x128xf32>
    %9 = arith.subf %4, %8 : vector<8x128xf32>
    %10 = arith.truncf %9 : vector<8x128xf32> to vector<8x128xbf16>
    %11 = arith.extf %10 : vector<8x128xbf16> to vector<8x128xf32>
    %12 = arith.subf %9, %11 : vector<8x128xf32>
    %13 = arith.truncf %12 : vector<8x128xf32> to vector<8x128xbf16>
    %cst_6 = arith.constant dense<0.000000e+00> : vector<8x384xf32>
    %14 = tpu.matmul %10, %5, %cst_6 {dimension_numbers = #tpu.dot_dimension_numbers<[1], [0], [0], [1], [0, 0, 1, 1], [], []>} : vector<8x128xbf16>, vector<128x384xbf16>, vector<8x384xf32> -> vector<8x384xf32>
    %15 = arith.addf %7, %14 : vector<8x384xf32>
    %cst_7 = arith.constant dense<0.000000e+00> : vector<8x384xf32>
    %16 = tpu.matmul %13, %5, %cst_7 {dimension_numbers = #tpu.dot_dimension_numbers<[1], [0], [0], [1], [0, 0, 1, 1], [], []>} : vector<8x128xbf16>, vector<128x384xbf16>, vector<8x384xf32> -> vector<8x384xf32>
    %17 = arith.addf %15, %16 : vector<8x384xf32>
    %18 = arith.subf %17, %3 : vector<8x384xf32>
    %c0_8 = arith.constant 0 : index
    %c0_9 = arith.constant 0 : index
    %19 = vector.load %arg2[%c0_8, %c0_9] : memref<2x384xf32, #tpu.memory_space<vmem>>, vector<1x384xf32>
    %c1 = arith.constant 1 : index
    %c0_10 = arith.constant 0 : index
    %20 = vector.load %arg2[%c1, %c0_10] : memref<2x384xf32, #tpu.memory_space<vmem>>, vector<1x384xf32>
    %21 = vector.broadcast %19 : vector<1x384xf32> to vector<8x384xf32>
    %22 = arith.mulf %21, %18 : vector<8x384xf32>
    %23 = vector.broadcast %20 : vector<1x384xf32> to vector<8x384xf32>
    %24 = arith.mulf %23, %18 : vector<8x384xf32>
    %25 = arith.maximumf %22, %24 : vector<8x384xf32>
    %c0_11 = arith.constant 0 : index
    %c0_12 = arith.constant 0 : index
    %26 = vector.load %arg6[%c0_11, %c0_12] : memref<8x384xf32, #tpu.memory_space<vmem>>, vector<1x384xf32>
    %cst_13 = arith.constant dense<0.000000e+00> : vector<384xf32>
    %27 = vector.multi_reduction <add>, %25, %cst_13 [0] : vector<8x384xf32> to vector<384xf32>
    %28 = vector.shape_cast %27 : vector<384xf32> to vector<1x384xf32>
    %29 = arith.addf %26, %28 : vector<1x384xf32>
    %c0_14 = arith.constant 0 : index
    %c0_15 = arith.constant 0 : index
    %30 = vector.load %arg6[%c0_14, %c0_15] : memref<8x384xf32, #tpu.memory_space<vmem>>, vector<1x384xf32>
    tpu.vector_store %arg6[%c0_14, %c0_15], %29 {strides = array<i32>} : memref<8x384xf32, #tpu.memory_space<vmem>>, vector<1x384xf32>,
    return
  }
  func.func @transform_0(%arg0: i32, %arg1: i32) -> (i32, i32) {
    %c0_i32 = arith.constant 0 : i32
    %c0_i32_0 = arith.constant 0 : i32
    %c0_i32_1 = arith.constant 0 : i32
    return %c0_i32, %c0_i32_0 : i32, i32
  }
  func.func @transform_1(%arg0: i32, %arg1: i32) -> (i32, i32) {
    %c0_i32 = arith.constant 0 : i32
    %c0_i32_0 = arith.constant 0 : i32
    %c0_i32_1 = arith.constant 0 : i32
    return %c0_i32, %c0_i32_0 : i32, i32
  }
  func.func @transform_2(%arg0: i32, %arg1: i32) -> (i32, i32) {
    %c1_i32 = arith.constant 1 : i32
    %0 = arith.muli %arg0, %c1_i32 : i32
    %1 = arith.addi %0, %arg1 : i32
    %c0_i32 = arith.constant 0 : i32
    %c0_i32_0 = arith.constant 0 : i32
    return %1, %c0_i32 : i32, i32
  }
  func.func @transform_3(%arg0: i32, %arg1: i32) -> (i32, i32) {
    %c1_i32 = arith.constant 1 : i32
    %0 = arith.muli %arg0, %c1_i32 : i32
    %1 = arith.addi %0, %arg1 : i32
    %c0_i32 = arith.constant 0 : i32
    %c0_i32_0 = arith.constant 0 : i32
    return %1, %c0_i32 : i32, i32
  }
  func.func @transform_4(%arg0: i32, %arg1: i32) -> (i32, i32) {
    %c0_i32 = arith.constant 0 : i32
    %c0_i32_0 = arith.constant 0 : i32
    return %arg0, %c0_i32 : i32, i32
  }
}

</mosaic_0001>

<bundles_post_ra>
// kernel: tpu_custom_call.1
= control target key start
LH: loop header
LB: loop body
LE: loop exit
PB: predicated region body
PF: predicated region fallthrough
CT: control target
= control target key end

     0   :  { %9 = vsyncpa [#allocation3], 0  ;;  %s1099_s0 = inlined_call_operand.hbm [shape: f32[2,384], index: 0, kind: input, shape index: {}]   ;;  %s1100_s1 = inlined_call_operand.hbm [shape: bf16[128,384], index: 1, kind: input, shape index: {}]   ;;  %s1101_s2 = inlined_call_operand.hbm [shape: f32[8,384], index: 2, kind: input, shape index: {}]   ;;  %s1102_s3 = inlined_call_operand.hbm [shape: f32[8,128], index: 3, kind: input, shape index: {}]   ;;  %s1103_s4 = inlined_call_operand.hbm [shape: f32[8,384], index: 4, kind: output, shape index: {}]  }
   0x1   :  { %10 = vsyncpa [#allocation6], 0 }
   0x2   :  { %11 = vsyncpa [#allocation9], 0 }
   0x3   :  { %12 = vsyncpa [#allocation4], 0  ;;  %s880_s15 = smov [#allocation5]  }
   0x4   :  { %s28_s16 = sshll.u32 %s880_s15, 4  ;;  %s29_s16 = int_to_ptr.vmem [resolvable:$true] %s28_s16 }
   0x5   :  { %s780_s17 = scalar_lea.vmem %s29_s16, 3072  ;;  %p785_p1 = scmp.lt.s32.totalorder %s29_s16, %s29_s16 }
   0x6   :  { %p781_p0 = scmp.ne.s32.totalorder %s29_s16, %s780_s17  ;;  %p786_p2 = scmp.lt.s32.totalorder %s780_s17, %s780_s17 }
   0x8   :  { %p787_p3 = por %p786_p2, %p785_p1 }
   0xa   :  { %p788_p4 = pnand %p787_p3, %p781_p0 }
   0xc   :  { %791 = shalt.err (!%p788_p4)
}
   0xd   :  { %s881_s18 = smov 192   ;;  %s882_s19 = smov 12  }
   0xe   :  { %34 = dma.hbm_to_vmem [thread:$0]  %s1100_s1, 3072, %s29_s16, [#allocation6], %s881_s18, %s881_s18, %s882_s19  }
   0xf   :  { %s883_s22 = smov [#allocation2]   ;;  %s884_s24 = smov [#allocation7]  }
  0x10   :  { %s19_s23 = sshll.u32 %s883_s22, 4  ;;  %s45_s25 = sshll.u32 %s884_s24, 4  ;;  %s20_s23 = int_to_ptr.vmem [resolvable:$true] %s19_s23  ;;  %s46_s25 = int_to_ptr.vmem [resolvable:$true] %s45_s25 }
  0x11   :  { %s800_s26 = scalar_lea.vmem %s20_s23, 96  ;;  %p805_p6 = scmp.lt.s32.totalorder %s20_s23, %s20_s23 }
  0x12   :  { %p801_p5 = scmp.ne.s32.totalorder %s20_s23, %s800_s26  ;;  %p806_p7 = scmp.lt.s32.totalorder %s800_s26, %s800_s26 }
  0x14   :  { %p807_p8 = por %p806_p7, %p805_p6 }
  0x16   :  { %p808_p9 = pnand %p807_p8, %p801_p5 }
  0x18   :  { %811 = shalt.err (!%p808_p9)
}
  0x19   :  { %22 = dma.hbm_to_vmem [thread:$0]  %s1099_s0, 96, %s20_s23, [#allocation3]  }
  0x1a   :  { %s820_s29 = scalar_lea.vmem %s46_s25, 384  ;;  %p825_p11 = scmp.lt.s32.totalorder %s46_s25, %s46_s25 }
  0x1b   :  { %p821_p10 = scmp.ne.s32.totalorder %s46_s25, %s820_s29  ;;  %p826_p12 = scmp.lt.s32.totalorder %s820_s29, %s820_s29 }
  0x1d   :  { %p827_p13 = por %p826_p12, %p825_p11 }
  0x1f   :  { %p828_p0 = pnand %p827_p13, %p821_p10 }
  0x21   :  { %831 = shalt.err (!%p828_p0)
}
  0x22   :  { %48 = dma.hbm_to_vmem [thread:$0]  %s1101_s2, 384, %s46_s25, [#allocation6]  }
  0x23   :  { %s885_s5 = smov [#allocation8]  }
  0x24   :  { %s58_s6 = sshll.u32 %s885_s5, 4  ;;  %s59_s6 = int_to_ptr.vmem [resolvable:$true] %s58_s6 }
  0x25   :  { %s840_s7 = scalar_lea.vmem %s59_s6, 128  ;;  %p845_p2 = scmp.lt.s32.totalorder %s59_s6, %s59_s6 }
  0x26   :  { %p841_p1 = scmp.ne.s32.totalorder %s59_s6, %s840_s7  ;;  %p846_p3 = scmp.lt.s32.totalorder %s840_s7, %s840_s7 }
  0x28   :  { %p847_p4 = por %p846_p3, %p845_p2 }
  0x2a   :  { %p848_p5 = pnand %p847_p4, %p841_p1 }
  0x2c   :  { %851 = shalt.err (!%p848_p5)
}
  0x2d   :  { %61 = dma.hbm_to_vmem [thread:$0]  %s1102_s3, 128, %s59_s6, [#allocation9]  }
  0x2e   :  { %872 = dma.done.wait [#allocation3], 96  }
  0x2f   :  { %873 = vsyncadd [#allocation3], 4294967200 }
  0x30   :  { %874 = dma.done.wait [#allocation6], 3456  }
  0x31   :  { %875 = vsyncadd [#allocation6], 4294963840 }
  0x32   :  { %876 = dma.done.wait [#allocation9], 128  }
  0x33   :  { %877 = vsyncadd [#allocation9], 4294967168  ;;  %v886_v0 = vmov 0.0   ;;  %vm887_vm0 = vmmov 0   ;;  %v888_v1 = vmov 0   ;;  %v87_v18 = vld [vmem:[#allocation8] sm:$0xff]  ;;  %v508_v50 = vlaneseq }
  0x34   :  { %669 = vmatprep.subr.bf16.mxu1 %v886_v0  ;;  %81 = vst [vmem:[#allocation10] sm:$0xff] %v886_v0  ;;  %82 = vst [vmem:[#allocation10 + $0x8] sm:$0xff] %v886_v0  ;;  %685 = vmatprep.mubr.msk.bf16.mxu1 %vm887_vm0, %v886_v0  ;;  %v935_v2 = vld [vmem:[#allocation5 + $0xac] ss:$12 sps:$4 sm:$0xff]   ;;  %v937_v3 = vld [vmem:[#allocation5 + $0xb0] ss:$12 sps:$4 sm:$0xff]   ;;  %v120_v20 = vpack.c.bf16 %v87_v18, %v87_v18 }
  0x35   :  { %83 = vst [vmem:[#allocation10 + $0x10] sm:$0xff] %v886_v0  ;;  %287 = vmatprep.mubr.bf16.mxu0 %v888_v1  ;;  %255 = vmatprep.subr.bf16.mxu0 %v935_v2  ;;  %v940_v4 = vld [vmem:[#allocation5 + $0xa8] ss:$12 sps:$4 sm:$0xff]   ;;  %v947_v6 = vld [vmem:[#allocation5 + $0x98] ss:$12 sps:$4 sm:$0xff]   ;;  %v509_v51 = vshrl.u32 %v508_v50, 7 }
  0x36   :  { %670 = vmatpush3.bf16.msra.mxu1 %v937_v3  ;;  %v943_v5 = vld [vmem:[#allocation5 + $0x94] ss:$12 sps:$4 sm:$0xff]   ;;  %256 = vmatpush1.bf16.msra.mxu0 %v940_v4  ;;  %v949_v7 = vld [vmem:[#allocation5 + $0x90] ss:$12 sps:$4 sm:$0xff]   ;;  %v959_v10 = vld [vmem:[#allocation5 + $0x78] ss:$12 sps:$4 sm:$0xff]   ;;  %v121_v23 = vunpack.c.l.bf16 %v120_v20 }
  0x37   :  { %671 = vmatprep.subr.bf16.mxu1 %v886_v0  ;;  %257 = vmatprep.subr.bf16.mxu0 %v943_v5  ;;  %v952_v8 = vld [vmem:[#allocation5 + $0x7c] ss:$12 sps:$4 sm:$0xff]   ;;  %v955_v9 = vld [vmem:[#allocation5 + $0x80] ss:$12 sps:$4 sm:$0xff]   ;;  %v962_v11 = vld [vmem:[#allocation5 + $0x64] ss:$12 sps:$4 sm:$0xff]  }
  0x38   :  { %v965_v12 = vld [vmem:[#allocation5 + $0x68] ss:$12 sps:$4 sm:$0xff]   ;;  %v969_v13 = vld [vmem:[#allocation5 + $0x60] ss:$12 sps:$4 sm:$0xff]   ;;  %v975_v15 = vld [vmem:[#allocation5 + $0x50] ss:$12 sps:$4 sm:$0xff]   ;;  %v1004_v27 = vsub.f32 %v87_v18, %v121_v23 }
  0x39   :  { %v972_v14 = vld [vmem:[#allocation5 + $0x4c] ss:$12 sps:$4 sm:$0xff]   ;;  %v979_v16 = vld [vmem:[#allocation5 + $0x48] ss:$12 sps:$4 sm:$0xff]   ;;  %v989_v21 = vld [vmem:[#allocation5 + $0x30] ss:$12 sps:$4 sm:$0xff]  }
  0x3a   :  { %672 = vmatpush3.bf16.msra.mxu1 %v947_v6  ;;  %258 = vmatpush1.bf16.msra.mxu0 %v949_v7  ;;  %v982_v17 = vld [vmem:[#allocation5 + $0x34] ss:$12 sps:$4 sm:$0xff]   ;;  %v985_v19 = vld [vmem:[#allocation5 + $0x38] ss:$12 sps:$4 sm:$0xff]   ;;  %v992_v22 = vld [vmem:[#allocation5 + $0x1c] ss:$12 sps:$4 sm:$0xff]   ;;  %v1016_v30 = vpack.c.bf16 %v1004_v27, %v1004_v27 }
  0x3b   :  { %673 = vmatprep.subr.bf16.mxu1 %v886_v0  ;;  %259 = vmatprep.subr.bf16.mxu0 %v952_v8  ;;  %v995_v24 = vld [vmem:[#allocation5 + $0x20] ss:$12 sps:$4 sm:$0xff]   ;;  %v999_v25 = vld [vmem:[#allocation5 + $0x18] ss:$12 sps:$4 sm:$0xff]   ;;  %v1007_v28 = vld [vmem:[#allocation5 + $0x8] ss:$12 sps:$4 sm:$0xff]  }
  0x3c   :  { %v1002_v26 = vld [vmem:[#allocation5 + $0x4] ss:$12 sps:$4 sm:$0xff]   ;;  %v1011_v29 = vld [vmem:[#allocation5] ss:$12 sps:$4 sm:$0xff]   ;;  %v124_v31 = vunpack.c.l.bf16 %v1016_v30  ;;  %v518_v53 = vsub.s32 2, %v509_v51  ;;  %v510_v55 = vsub.s32 0, %v509_v51 }
  0x3d   :  { %v504_v52 = vld [vmem:[#allocation2] ss:$2 sm:$0x7]  ;;  %v506_v54 = vld [vmem:[#allocation2 + $0x1] ss:$2 sm:$0x7] }
  0x3e   :  { %674 = vmatpush3.bf16.msra.mxu1 %v955_v9  ;;  %260 = vmatpush1.bf16.msra.mxu0 %v959_v10  ;;  %v125_v32 = vsub.f32 %v1004_v27, %v124_v31  ;;  %v86_v58 = vld [vmem:[#allocation7 + $0x10] sm:$0xff]  ;;  %v514_v60 = vsub.s32 1, %v509_v51  ;;  %v519_v62 = vrot.slane %v504_v52, %v518_v53  ;;  %v538_v63 = vrot.slane %v506_v54, %v518_v53  ;;  %s890_s2 = smov [#allocation10]  }
  0x3f   :  { %675 = vmatprep.subr.bf16.mxu1 %v886_v0  ;;  %261 = vmatprep.subr.bf16.mxu0 %v962_v11  ;;  %s607_s3 = sshll.u32 %s890_s2, 4  ;;  %vm597_vm1 = vcmp.lt.s32.totalorder %v508_v50, 384  ;;  %s608_s3 = int_to_ptr.vmem [resolvable:$true] %s607_s3 }
  0x40   :  { %v126_v33 = vpack.c.bf16 %v125_v32, %v125_v32  ;;  %s852_s9 = scalar_lea.vmem %s608_s3, 384  ;;  %p857_p7 = scmp.lt.s32.totalorder %s608_s3, %s608_s3 }
  0x41   :  { %p853_p6 = scmp.ne.s32.totalorder %s608_s3, %s852_s9  ;;  %p858_p8 = scmp.lt.s32.totalorder %s852_s9, %s852_s9 }
  0x42   :  { %676 = vmatpush3.bf16.msra.mxu1 %v965_v12  ;;  %262 = vmatpush1.bf16.msra.mxu0 %v969_v13 }
  0x43   :  { %677 = vmatprep.subr.bf16.mxu1 %v886_v0  ;;  %263 = vmatprep.subr.bf16.mxu0 %v972_v14  ;;  %p859_p9 = por %p858_p8, %p857_p7 }
  0x45   :  { %p860_p10 = pnand %p859_p9, %p853_p6 }
  0x46   :  { %678 = vmatpush3.bf16.msra.mxu1 %v975_v15  ;;  %264 = vmatpush1.bf16.msra.mxu0 %v979_v16 }
  0x47   :  { %679 = vmatprep.subr.bf16.mxu1 %v886_v0  ;;  %265 = vmatprep.subr.bf16.mxu0 %v982_v17 }
  0x4a   :  { %680 = vmatpush3.bf16.msra.mxu1 %v985_v19  ;;  %266 = vmatpush1.bf16.msra.mxu0 %v989_v21 }
  0x4b   :  { %681 = vmatprep.subr.bf16.mxu1 %v886_v0  ;;  %267 = vmatprep.subr.bf16.mxu0 %v992_v22 }
  0x4e   :  { %682 = vmatpush3.bf16.msra.mxu1 %v995_v24  ;;  %268 = vmatpush1.bf16.msra.mxu0 %v999_v25 }
  0x4f   :  { %683 = vmatprep.subr.bf16.mxu1 %v886_v0  ;;  %269 = vmatprep.subr.bf16.mxu0 %v1002_v26 }
  0x52   :  { %684 = vmatpush3.bf16.msra.mxu1 %v1007_v28  ;;  %270 = vmatpush1.bf16.msra.mxu0 %v1011_v29 }
  0x53   :  { %689 = vmatprep.subr.bf16.mxu1 %v886_v0  ;;  %336 = vmatprep.subr.bf16.mxu0 %v935_v2 }
  0x55   :  { %686 = vmatmul.mubr.bf16.vlgmr.msra.gmra.mxu1 %v1016_v30  ;;  %288 = vmatmul.mubr.bf16.vlgmr.msra.gmra.mxu0 %v1016_v30 }
  0x56   :  { %690 = vmatpush3.bf16.msra.mxu1 %v937_v3  ;;  %337 = vmatpush1.bf16.msra.mxu0 %v940_v4 }
  0x57   :  { %691 = vmatprep.subr.bf16.mxu1 %v886_v0  ;;  %338 = vmatprep.subr.bf16.mxu0 %v943_v5 }
  0x58   :  { %705 = vmatprep.mubr.msk.bf16.mxu1 %vm887_vm0, %v886_v0  ;;  %368 = vmatprep.mubr.bf16.mxu0 %v888_v1 }
  0x5a   :  { %692 = vmatpush3.bf16.msra.mxu1 %v947_v6  ;;  %339 = vmatpush1.bf16.msra.mxu0 %v949_v7 }
  0x5b   :  { %693 = vmatprep.subr.bf16.mxu1 %v886_v0  ;;  %340 = vmatprep.subr.bf16.mxu0 %v952_v8 }
  0x5e   :  { %694 = vmatpush3.bf16.msra.mxu1 %v955_v9  ;;  %341 = vmatpush1.bf16.msra.mxu0 %v959_v10 }
  0x5f   :  { %695 = vmatprep.subr.bf16.mxu1 %v886_v0  ;;  %342 = vmatprep.subr.bf16.mxu0 %v962_v11 }
  0x62   :  { %696 = vmatpush3.bf16.msra.mxu1 %v965_v12  ;;  %343 = vmatpush1.bf16.msra.mxu0 %v969_v13 }
  0x63   :  { %697 = vmatprep.subr.bf16.mxu1 %v886_v0  ;;  %344 = vmatprep.subr.bf16.mxu0 %v972_v14 }
  0x66   :  { %698 = vmatpush3.bf16.msra.mxu1 %v975_v15  ;;  %345 = vmatpush1.bf16.msra.mxu0 %v979_v16 }
  0x67   :  { %699 = vmatprep.subr.bf16.mxu1 %v886_v0  ;;  %346 = vmatprep.subr.bf16.mxu0 %v982_v17 }
  0x6a   :  { %700 = vmatpush3.bf16.msra.mxu1 %v985_v19  ;;  %347 = vmatpush1.bf16.msra.mxu0 %v989_v21 }
  0x6b   :  { %701 = vmatprep.subr.bf16.mxu1 %v886_v0  ;;  %348 = vmatprep.subr.bf16.mxu0 %v992_v22 }
  0x6e   :  { %702 = vmatpush3.bf16.msra.mxu1 %v995_v24  ;;  %349 = vmatpush1.bf16.msra.mxu0 %v999_v25 }
  0x6f   :  { %703 = vmatprep.subr.bf16.mxu1 %v886_v0  ;;  %350 = vmatprep.subr.bf16.mxu0 %v1002_v26 }
  0x72   :  { %704 = vmatpush3.bf16.msra.mxu1 %v1007_v28  ;;  %351 = vmatpush1.bf16.msra.mxu0 %v1011_v29 }
  0x73   :  { %709 = vmatprep.subr.bf16.mxu1 %v886_v0  ;;  %417 = vmatprep.subr.bf16.mxu0 %v935_v2 }
  0x75   :  { %706 = vmatmul.mubr.bf16.vlgmr.msra.gmra.mxu1 %v120_v20  ;;  %369 = vmatmul.mubr.bf16.vlgmr.msra.gmra.mxu0 %v120_v20 }
  0x76   :  { %710 = vmatpush3.bf16.msra.mxu1 %v937_v3  ;;  %418 = vmatpush1.bf16.msra.mxu0 %v940_v4  ;;  %v511_v4 = vrot.slane %v504_v52, %v510_v55 }
  0x77   :  { %711 = vmatprep.subr.bf16.mxu1 %v886_v0  ;;  %419 = vmatprep.subr.bf16.mxu0 %v943_v5  ;;  %v530_v5 = vrot.slane %v506_v54, %v510_v55 }
  0x78   :  { %725 = vmatprep.mubr.msk.bf16.mxu1 %vm887_vm0, %v886_v0  ;;  %449 = vmatprep.mubr.bf16.mxu0 %v888_v1 }
  0x7a   :  { %712 = vmatpush3.bf16.msra.mxu1 %v947_v6  ;;  %420 = vmatpush1.bf16.msra.mxu0 %v949_v7 }
  0x7b   :  { %713 = vmatprep.subr.bf16.mxu1 %v886_v0  ;;  %421 = vmatprep.subr.bf16.mxu0 %v952_v8  ;;  %v85_v8 = vld [vmem:[#allocation7 + $0x8] sm:$0xff] }
  0x7e   :  { %714 = vmatpush3.bf16.msra.mxu1 %v955_v9  ;;  %422 = vmatpush1.bf16.msra.mxu0 %v959_v10 }
  0x7f   :  { %715 = vmatprep.subr.bf16.mxu1 %v886_v0  ;;  %423 = vmatprep.subr.bf16.mxu0 %v962_v11 }
  0x82   :  { %716 = vmatpush3.bf16.msra.mxu1 %v965_v12  ;;  %424 = vmatpush1.bf16.msra.mxu0 %v969_v13  ;;  %v515_v12 = vrot.slane %v504_v52, %v514_v60  ;;  %v534_v13 = vrot.slane %v506_v54, %v514_v60 }
  0x83   :  { %717 = vmatprep.subr.bf16.mxu1 %v886_v0  ;;  %425 = vmatprep.subr.bf16.mxu0 %v972_v14 }
  0x86   :  { %718 = vmatpush3.bf16.msra.mxu1 %v975_v15  ;;  %426 = vmatpush1.bf16.msra.mxu0 %v979_v16 }
  0x87   :  { %719 = vmatprep.subr.bf16.mxu1 %v886_v0  ;;  %427 = vmatprep.subr.bf16.mxu0 %v982_v17 }
  0x8a   :  { %720 = vmatpush3.bf16.msra.mxu1 %v985_v19  ;;  %428 = vmatpush1.bf16.msra.mxu0 %v989_v21 }
  0x8b   :  { %721 = vmatprep.subr.bf16.mxu1 %v886_v0  ;;  %429 = vmatprep.subr.bf16.mxu0 %v992_v22 }
  0x8e   :  { %722 = vmatpush3.bf16.msra.mxu1 %v995_v24  ;;  %430 = vmatpush1.bf16.msra.mxu0 %v999_v25 }
  0x8f   :  { %723 = vmatprep.subr.bf16.mxu1 %v886_v0  ;;  %431 = vmatprep.subr.bf16.mxu0 %v1002_v26  ;;  %v84_v0 = vld [vmem:[#allocation7] sm:$0xff] }
  0x92   :  { %724 = vmatpush3.bf16.msra.mxu1 %v1007_v28  ;;  %432 = vmatpush1.bf16.msra.mxu0 %v1011_v29 }
  0x95   :  { %726 = vmatmul.mubr.bf16.vlgmr.msra.gmra.mxu1 %v126_v33  ;;  %450 = vmatmul.mubr.bf16.vlgmr.msra.gmra.mxu0 %v126_v33 }
 0x115   :  { %v330_v34 = vpop.f32.mrf.mxu1  ;;  %v289_v35 = vpop.f32.mrf.mxu0 }
 0x117   :  { %v687_v36 = vpop.f32.mrf.mxu1  ;;  %v291_v37 = vpop.f32.mrf.mxu0 }
 0x119   :  { %v333_v38 = vpop.f32.mrf.mxu1  ;;  %v293_v39 = vpop.f32.mrf.mxu0 }
 0x11b   :  { %v688_v40 = vpop.f32.mrf.mxu1  ;;  %v294_v41 = vpop.f32.mrf.mxu0 }
 0x135   :  { %v411_v42 = vpop.f32.mrf.mxu1  ;;  %v370_v43 = vpop.f32.mrf.mxu0 }
 0x136   :  { %v412_v56 = vadd.f32 %v411_v42, %v330_v34  ;;  %v371_v57 = vadd.f32 %v370_v43, %v289_v35  ;;  %v889_v34 = vmov 1966171168  }
 0x137   :  { %v707_v44 = vpop.f32.mrf.mxu1  ;;  %v372_v45 = vpop.f32.mrf.mxu0  ;;  %v572_v35 = vunpack.c.l.s4 %v889_v34 }
 0x138   :  { %v373_v2 = vadd.f32 %v372_v45, %v291_v37 }
 0x139   :  { %v414_v46 = vpop.f32.mrf.mxu1  ;;  %v374_v47 = vpop.f32.mrf.mxu0  ;;  %v573_v42 = vunpack.c.0.s8 %v572_v35 }
 0x13b   :  { %v708_v48 = vpop.f32.mrf.mxu1  ;;  %v375_v49 = vpop.f32.mrf.mxu0  ;;  %v576_v47 = vsub.s32 %v573_v42, %v509_v51 }
 0x155   :  { %v492_v59 = vpop.f32.mrf.mxu1  ;;  %v451_v1 = vpop.f32.mrf.mxu0 }
 0x156   :  { %v500_v61 = vadd.f32 %v492_v59, %v412_v56  ;;  %v498_v3 = vadd.f32 %v451_v1, %v371_v57  ;;  %v548_v56 = vld [vmem:[#allocation10] ss:$8 sm:$0x7] }
 0x157   :  { %v727_v6 = vpop.f32.mrf.mxu1  ;;  %v453_v9 = vpop.f32.mrf.mxu0 }
 0x158   :  { %v503_v7 = vsub.f32 %v500_v61, %v86_v58  ;;  %v501_v10 = vsub.f32 %v498_v3, %v84_v0  ;;  %v499_v11 = vadd.f32 %v453_v9, %v373_v2 }
 0x159   :  { %v495_v14 = vpop.f32.mrf.mxu1  ;;  %v455_v17 = vpop.f32.mrf.mxu0 }
 0x15a   :  { %v525_v15 = vmul.f32 %v519_v62, %v503_v7  ;;  %v544_v16 = vmul.f32 %v538_v63, %v503_v7  ;;  %v523_v18 = vmul.f32 %v511_v4, %v501_v10  ;;  %v542_v19 = vmul.f32 %v530_v5, %v501_v10 }
 0x15b   :  { %v502_v20 = vsub.f32 %v499_v11, %v85_v8  ;;  %v728_v21 = vpop.f32.mrf.mxu1  ;;  %v456_v23 = vpop.f32.mrf.mxu0 }
 0x15c   :  { %v547_v22 = vmax.f32 %v525_v15, %v544_v16  ;;  %v545_v24 = vmax.f32 %v523_v18, %v542_v19 }
 0x15d   :  { %v524_v25 = vmul.f32 %v515_v12, %v502_v20  ;;  %v543_v26 = vmul.f32 %v534_v13, %v502_v20 }
 0x15e   :  { %v561_v27 = vrot.slane %v547_v22, 4  ;;  %v549_v28 = vrot.slane %v545_v24, 4 }
 0x15f   :  { %v546_v29 = vmax.f32 %v524_v25, %v543_v26 }
 0x160   :  { %v562_v30 = vadd.f32 %v561_v27, %v547_v22  ;;  %v550_v31 = vadd.f32 %v549_v28, %v545_v24 }
 0x161   :  { %v555_v32 = vrot.slane %v546_v29, 4 }
 0x162   :  { %v563_v33 = vrot.slane %v562_v30, 2  ;;  %v551_v36 = vrot.slane %v550_v31, 2 }
 0x163   :  { %v556_v37 = vadd.f32 %v555_v32, %v546_v29 }
 0x164   :  { %v564_v38 = vadd.f32 %v563_v33, %v562_v30  ;;  %v552_v39 = vadd.f32 %v551_v36, %v550_v31 }
 0x165   :  { %v557_v40 = vrot.slane %v556_v37, 2 }
 0x166   :  { %v565_v41 = vrot.slane %v564_v38, 1  ;;  %v553_v43 = vrot.slane %v552_v39, 1 }
 0x167   :  { %v558_v44 = vadd.f32 %v557_v40, %v556_v37 }
 0x168   :  { %v566_v46 = vadd.f32 %v565_v41, %v564_v38  ;;  %v554_v48 = vadd.f32 %v553_v43, %v552_v39 }
 0x169   :  { %v559_v45 = vrot.slane %v558_v44, 1 }
 0x16a   :  { %v584_v53 = vrot.slane %v566_v46, %v576_v47 }
 0x16b   :  { %v560_v49 = vadd.f32 %v559_v45, %v558_v44 }
 0x16d   :  { %v570_v52 = vcombine.low %v554_v48, %v560_v49 }
 0x16f   :  { %v577_v54 = vrot.slane %v570_v52, %v576_v47 }
 0x171   :  { %v585_v55 = vcombine.low %v577_v54, %v584_v53 }
 0x173   :  { %v592_v57 = vrot.slane %v585_v55, %v576_v47 }
 0x175   :  { %v594_v58 = vadd.f32 %v592_v57, %v548_v56 }
 0x177   :  { %599 = vst.msk [vmem:[#allocation10] ss:$8 sm:$0x7] %vm597_vm1, %v594_v58 }
 0x178   :  { %863 = shalt.err (!%p860_p10)
}
 0x179   :  { %610 = dma.vmem_to_hbm [thread:$0]  %s608_s3, 384, %s1103_s4, [#allocation4]  }
 0x17a   :  { %878 = dma.done.wait [#allocation4], 384  }
 0x17b   :  { %879 = vsyncadd [#allocation4], 4294966912 }
 0x17c   :  { %614 = vsyncpa [#allocation3], 1 }
 0x17d   :  { %615 = vsyncpa [#allocation6], 1 }
 0x17e   :  { %616 = vsyncpa [#allocation9], 1 }
 0x17f   :  { %617 = vsyncpa [#allocation4], 1 }

</bundles_post_ra>
